<compile_context>
chip_gen: v7x
topology: tpu7x:2x2x1
jax: 0.10.0
libtpu: 0.0.40
codegen_flags: <defaults>
</compile_context>

<pallas_src>
import functools
import math

import numpy as np
import jax
import jax.numpy as jnp
from jax.experimental import pallas as pl
from jax.experimental.pallas import tpu as pltpu


_VMEM_LIMIT = 48 * 1024 * 1024   # < 64 MiB physical on v7x; raises v5e/v6e 16/32 MiB scoped default
_GELU_C = math.sqrt(2.0 / math.pi)


# ----------------------------------------------------------------------------
# Tiling helper
# ----------------------------------------------------------------------------
def _pick_tile(dim, target, align):
    """Largest multiple of `align` that divides `dim` and is <= target; else full dim."""
    if dim % align != 0:
        return dim            # full-dim block is always legal (block == array dim)
    t = min(target, dim)
    t -= t % align
    while t > align and dim % t != 0:
        t -= align
    if t <= 0 or dim % t != 0:
        return dim
    return t


# ----------------------------------------------------------------------------
# Tiled linear:  y = x @ w + b   (bf16 operands, f32 accumulator)
# ----------------------------------------------------------------------------
def _matmul_kernel(x_ref, w_ref, b_ref, o_ref, acc_ref):
    k = pl.program_id(2)

    @pl.when(k == 0)
    def _():
        acc_ref[...] = jnp.zeros_like(acc_ref)

    acc_ref[...] += jnp.dot(x_ref[...].astype(jnp.bfloat16), w_ref[...],
                            preferred_element_type=jnp.float32)

    @pl.when(k == pl.num_programs(2) - 1)
    def _():
        o_ref[...] = (acc_ref[...] + b_ref[...]).astype(o_ref.dtype)


def pallas_linear(x, w, b, *, out_dtype=jnp.float32,
                  tm_target=512, tn_target=256, tk_target=1024):
    M, K = x.shape
    N = w.shape[1]
    tm = _pick_tile(M, tm_target, 8)
    tn = _pick_tile(N, tn_target, 128)
    tk = _pick_tile(K, tk_target, 128)
    grid = (M // tm, N // tn, K // tk)
    return pl.pallas_call(
        _matmul_kernel,
        grid=grid,
        in_specs=[
            pl.BlockSpec((tm, tk), lambda i, j, k: (i, k)),
            pl.BlockSpec((tk, tn), lambda i, j, k: (k, j)),
            pl.BlockSpec((1, tn), lambda i, j, k: (0, j)),
        ],
        out_specs=pl.BlockSpec((tm, tn), lambda i, j, k: (i, j)),
        out_shape=jax.ShapeDtypeStruct((M, N), out_dtype),
        scratch_shapes=[pltpu.VMEM((tm, tn), jnp.float32)],
        compiler_params=pltpu.CompilerParams(
            dimension_semantics=("parallel", "parallel", "arbitrary"),
            vmem_limit_bytes=_VMEM_LIMIT),
    )(x, w, b)


# ----------------------------------------------------------------------------
# Fused residual-add + LayerNorm (f32 statistics)
# ----------------------------------------------------------------------------
def _add_ln_kernel(x_ref, r_ref, g_ref, b_ref, o_ref, *, eps):
    x = x_ref[...] + r_ref[...]
    mu = jnp.mean(x, axis=-1, keepdims=True)
    var = jnp.mean(jnp.square(x - mu), axis=-1, keepdims=True)
    o_ref[...] = (x - mu) * jax.lax.rsqrt(var + eps) * g_ref[...] + b_ref[...]


def pallas_add_layer_norm(x, res, g, b, eps):
    B, S, D = x.shape
    M = B * S
    tm = _pick_tile(M, 512, 8)
    out = pl.pallas_call(
        functools.partial(_add_ln_kernel, eps=eps),
        grid=(M // tm,),
        in_specs=[
            pl.BlockSpec((tm, D), lambda i: (i, 0)),
            pl.BlockSpec((tm, D), lambda i: (i, 0)),
            pl.BlockSpec((1, D), lambda i: (0, 0)),
            pl.BlockSpec((1, D), lambda i: (0, 0)),
        ],
        out_specs=pl.BlockSpec((tm, D), lambda i: (i, 0)),
        out_shape=jax.ShapeDtypeStruct((M, D), jnp.float32),
        compiler_params=pltpu.CompilerParams(dimension_semantics=("parallel",)),
    )(x.reshape(M, D), res.reshape(M, D), g, b)
    return out.reshape(B, S, D)


# ----------------------------------------------------------------------------
# Fused position-wise FFN, tiled over Dff:  gelu(x @ w1 + b1) @ w2 + b2
# ----------------------------------------------------------------------------
def _ffn_kernel(x_ref, w1_ref, b1_ref, w2_ref, b2_ref, o_ref, acc_ref):
    j = pl.program_id(1)

    @pl.when(j == 0)
    def _():
        acc_ref[...] = jnp.zeros_like(acc_ref)

    h = jnp.dot(x_ref[...].astype(jnp.bfloat16), w1_ref[...],
                preferred_element_type=jnp.float32) + b1_ref[...]
    # TODO(synk): PyTorch F.gelu defaults to exact erf; tanh approximation is used here since
    # erf lowering inside Mosaic kernels is not guaranteed (max abs delta ~1e-3 in activation).
    h = 0.5 * h * (1.0 + jnp.tanh(_GELU_C * (h + 0.044715 * h * h * h)))
    acc_ref[...] += jnp.dot(h.astype(jnp.bfloat16), w2_ref[...],
                            preferred_element_type=jnp.float32)

    @pl.when(j == pl.num_programs(1) - 1)
    def _():
        o_ref[...] = acc_ref[...] + b2_ref[...]


def pallas_ffn(x, p, *, tm_target=256, tdff_target=512):
    B, S, D = x.shape
    M = B * S
    Dff = p["w1"].shape[1]
    tm = _pick_tile(M, tm_target, 8)
    tdff = _pick_tile(Dff, tdff_target, 128)
    out = pl.pallas_call(
        _ffn_kernel,
        grid=(M // tm, Dff // tdff),
        in_specs=[
            pl.BlockSpec((tm, D), lambda i, j: (i, 0)),
            pl.BlockSpec((D, tdff), lambda i, j: (0, j)),
            pl.BlockSpec((1, tdff), lambda i, j: (0, j)),
            pl.BlockSpec((tdff, D), lambda i, j: (j, 0)),
            pl.BlockSpec((1, D), lambda i, j: (0, 0)),
        ],
        out_specs=pl.BlockSpec((tm, D), lambda i, j: (i, 0)),
        out_shape=jax.ShapeDtypeStruct((M, D), jnp.float32),
        scratch_shapes=[pltpu.VMEM((tm, D), jnp.float32)],
        compiler_params=pltpu.CompilerParams(
            dimension_semantics=("parallel", "arbitrary"),
            vmem_limit_bytes=_VMEM_LIMIT),
    )(x.reshape(M, D), p["w1"], p["b1"], p["w2"], p["b2"])
    return out.reshape(B, S, D)


# ----------------------------------------------------------------------------
# Attention: per-head slicing inside the kernel, grid over (batch, q-tiles)
# The 1/sqrt(d_head) scale is pre-folded into W_Q, so scores are plain q @ k^T + bias.
# ----------------------------------------------------------------------------
def _one_head(q_h, k_h, v_h, bias):
    # q_h: (tq, dh) bf16 ; k_h/v_h: (Sk, dh) bf16 ; bias: (tq, Sk) f32 additive (0 / -1e9)
    s = jax.lax.dot_general(q_h, k_h, (((1,), (1,)), ((), ())),
                            preferred_element_type=jnp.float32)
    s = s + bias
    mx = jnp.max(s, axis=-1, keepdims=True)
    e = jnp.exp(s - mx)
    p = e * pl.reciprocal(jnp.sum(e, axis=-1, keepdims=True), approx=True)
    ctx_h = jnp.dot(p.astype(v_h.dtype), v_h, preferred_element_type=jnp.float32)
    return ctx_h, p


def _self_attn_kernel(q_ref, kv_ref, bias_ref, ctx_ref, prob_ref, *, H, dh):
    # q_ref: (tq, 3*Dqk) row tile of fused QKV; kv_ref: (Sk, 3*Dqk) full rows (for K/V)
    Dqk = H * dh
    bias = bias_ref[...]
    for h in range(H):
        o = h * dh
        ctx_h, p = _one_head(q_ref[:, o:o + dh],
                             kv_ref[:, Dqk + o:Dqk + o + dh],
                             kv_ref[:, 2 * Dqk + o:2 * Dqk + o + dh],
                             bias)
        ctx_ref[:, o:o + dh] = ctx_h.astype(ctx_ref.dtype)
        prob_ref[h, :, :] = p.astype(prob_ref.dtype)


def _cross_attn_kernel(q_ref, kv_ref, bias_ref, ctx_ref, prob_ref, *, H, dh):
    # q_ref: (tq, Dqk); kv_ref: (Sk, 2*Dqk) fused K/V
    Dqk = H * dh
    bias = bias_ref[...]
    for h in range(H):
        o = h * dh
        ctx_h, p = _one_head(q_ref[:, o:o + dh],
                             kv_ref[:, o:o + dh],
                             kv_ref[:, Dqk + o:Dqk + o + dh],
                             bias)
        ctx_ref[:, o:o + dh] = ctx_h.astype(ctx_ref.dtype)
        prob_ref[h, :, :] = p.astype(prob_ref.dtype)


def _attention_call(kernel, q_arr, kv_arr, bias, H, dh, Sq, Sk, B):
    Dqk = H * dh
    tq = _pick_tile(Sq, 256, 8)
    grid = (B, Sq // tq)
    ctx, prob = pl.pallas_call(
        functools.partial(kernel, H=H, dh=dh),
        grid=grid,
        in_specs=[
            pl.BlockSpec((None, tq, q_arr.shape[2]), lambda b, qt: (b, qt, 0)),
            pl.BlockSpec((None, Sk, kv_arr.shape[2]), lambda b, qt: (b, 0, 0)),
            pl.BlockSpec((None, tq, Sk), lambda b, qt: (b, qt, 0)),
        ],
        out_specs=[
            pl.BlockSpec((None, tq, Dqk), lambda b, qt: (b, qt, 0)),
            pl.BlockSpec((None, H, tq, Sk), lambda b, qt: (b, 0, qt, 0)),
        ],
        out_shape=[
            jax.ShapeDtypeStruct((B, Sq, Dqk), jnp.bfloat16),     # context feeds next matmul
            # attention probs returned in bf16 (values in [0,1]); halves HBM writeback.
            jax.ShapeDtypeStruct((B, H, Sq, Sk), jnp.bfloat16),
        ],
        compiler_params=pltpu.CompilerParams(
            dimension_semantics=("parallel", "parallel"),
            vmem_limit_bytes=_VMEM_LIMIT),
    )(q_arr, kv_arr, bias)
    return ctx, prob


# TODO(synk): for very long sequences, the Sk axis could additionally be tiled flash-style
# with an online softmax; here Sk stays fully VMEM-resident per (batch, q-tile) step.
def pallas_self_attention(qkv, bias, H, dh):
    B, S, _ = qkv.shape
    # qkv is passed twice: once row-tiled (Q source) and once full (K/V source).
    return _attention_call(_self_attn_kernel, qkv, qkv, bias, H, dh, S, S, B)


def pallas_cross_attention(q, kv, bias, H, dh):
    B, Sq, _ = q.shape
    Sk = kv.shape[1]
    return _attention_call(_cross_attn_kernel, q, kv, bias, H, dh, Sq, Sk, B)


# ----------------------------------------------------------------------------
# Fused max-pool over sequence + bias-free projection (lane-dense padded output)
# ----------------------------------------------------------------------------
def _pool_proj_kernel(x_ref, w_ref, o_ref):
    pooled = jnp.max(x_ref[...], axis=1)                       # (tb, D)
    o_ref[...] = jnp.dot(pooled.astype(jnp.bfloat16), w_ref[...],
                         preferred_element_type=jnp.float32)


def pallas_maxpool_projection(x, w_pad, n_out):
    B, S, D = x.shape
    n_pad = w_pad.shape[1]
    tb = _pick_tile(B, 128, 8)
    out = pl.pallas_call(
        _pool_proj_kernel,
        grid=(B // tb,),
        in_specs=[
            pl.BlockSpec((tb, S, D), lambda i: (i, 0, 0)),
            pl.BlockSpec((D, n_pad), lambda i: (0, 0)),
        ],
        out_specs=pl.BlockSpec((tb, n_pad), lambda i: (i, 0)),
        out_shape=jax.ShapeDtypeStruct((B, n_pad), jnp.float32),
        compiler_params=pltpu.CompilerParams(dimension_semantics=("parallel",)),
    )(x, w_pad)
    return out[:, :n_out]


# ----------------------------------------------------------------------------
# Model glue (plain JAX): embeddings, masks, layer wiring
# ----------------------------------------------------------------------------
def get_sinusoid_encoding_table(n_seq, d_hidn):
    pos = np.arange(n_seq)[:, None].astype(np.float64)
    i = np.arange(d_hidn)[None, :]
    angle = pos / np.power(10000.0, 2 * (i // 2) / d_hidn)
    table = np.zeros((n_seq, d_hidn), dtype=np.float64)
    table[:, 0::2] = np.sin(angle[:, 0::2])
    table[:, 1::2] = np.cos(angle[:, 1::2])
    return jnp.asarray(table, jnp.float32)


def pad_attn_bias(seq_q, seq_k, i_pad):
    """Additive attention bias: 0 where attendable, -1e9 where key is padding."""
    B, Lq = seq_q.shape
    Lk = seq_k.shape[1]
    pad = jnp.broadcast_to((seq_k == i_pad)[:, None, :], (B, Lq, Lk))
    return jnp.where(pad, jnp.float32(-1e9), jnp.float32(0.0))


def decoder_self_attn_bias(seq, i_pad):
    B, L = seq.shape
    pad = jnp.broadcast_to((seq == i_pad)[:, None, :], (B, L, L))
    sub = jnp.triu(jnp.ones((L, L), jnp.int32), k=1)[None] > 0
    masked = jnp.logical_or(pad, sub)
    return jnp.where(masked, jnp.float32(-1e9), jnp.float32(0.0))


def multi_head_self_attention(x, attn_bias, p, cfg):
    B, S, D = x.shape
    H, dh = cfg["n_head"], cfg["d_head"]
    Dqk = H * dh
    # single fused QKV projection, emitted in bf16 (feeds the attention matmuls directly)
    qkv = pallas_linear(x.reshape(B * S, D), p["w_qkv"], p["b_qkv"],
                        out_dtype=jnp.bfloat16).reshape(B, S, 3 * Dqk)
    ctx, prob = pallas_self_attention(qkv, attn_bias, H, dh)
    out = pallas_linear(ctx.reshape(B * S, Dqk), p["wo"], p["bo"]).reshape(B, S, D)
    # dropout (eval mode) -> identity
    return out, prob


def multi_head_cross_attention(x_q, x_kv, attn_bias, p, cfg):
    B, Sq, D = x_q.shape
    Sk = x_kv.shape[1]
    H, dh = cfg["n_head"], cfg["d_head"]
    Dqk = H * dh
    q = pallas_linear(x_q.reshape(B * Sq, D), p["w_q"], p["b_q"],
                      out_dtype=jnp.bfloat16).reshape(B, Sq, Dqk)
    kv = pallas_linear(x_kv.reshape(B * Sk, D), p["w_kv"], p["b_kv"],
                       out_dtype=jnp.bfloat16).reshape(B, Sk, 2 * Dqk)
    ctx, prob = pallas_cross_attention(q, kv, attn_bias, H, dh)
    out = pallas_linear(ctx.reshape(B * Sq, Dqk), p["wo"], p["bo"]).reshape(B, Sq, D)
    return out, prob


def transformer_forward(params, cfg, enc_inputs, dec_inputs):
    i_pad = cfg["i_pad"]
    eps = cfg["layer_norm_epsilon"]
    B, Se = enc_inputs.shape
    Sd = dec_inputs.shape[1]

    # ---------------- Encoder ----------------
    pos_e = jnp.broadcast_to(jnp.arange(1, Se + 1, dtype=jnp.int32)[None, :], (B, Se))
    pos_e = jnp.where(enc_inputs == i_pad, 0, pos_e)
    enc_out = params["enc_emb"][enc_inputs] + params["enc_pos"][pos_e]
    enc_bias = pad_attn_bias(enc_inputs, enc_inputs, i_pad)

    enc_self_attn_probs = []
    for lp in params["enc_layers"]:
        att_out, prob = multi_head_self_attention(enc_out, enc_bias, lp["self_attn"], cfg)
        att_out = pallas_add_layer_norm(enc_out, att_out, lp["ln1_g"], lp["ln1_b"], eps)
        ffn_out = pallas_ffn(att_out, lp["ffn"])
        enc_out = pallas_add_layer_norm(att_out, ffn_out, lp["ln2_g"], lp["ln2_b"], eps)
        enc_self_attn_probs.append(prob)

    # ---------------- Decoder ----------------
    pos_d = jnp.broadcast_to(jnp.arange(1, Sd + 1, dtype=jnp.int32)[None, :], (B, Sd))
    pos_d = jnp.where(dec_inputs == i_pad, 0, pos_d)
    dec_out = params["dec_emb"][dec_inputs] + params["dec_pos"][pos_d]

    dec_self_bias = decoder_self_attn_bias(dec_inputs, i_pad)
    dec_enc_bias = pad_attn_bias(dec_inputs, enc_inputs, i_pad)

    dec_self_attn_probs, dec_enc_attn_probs = [], []
    for lp in params["dec_layers"]:
        sa_out, sa_prob = multi_head_self_attention(dec_out, dec_self_bias,
                                                    lp["self_attn"], cfg)
        sa_out = pallas_add_layer_norm(dec_out, sa_out, lp["ln1_g"], lp["ln1_b"], eps)
        de_out, de_prob = multi_head_cross_attention(sa_out, enc_out, dec_enc_bias,
                                                     lp["dec_enc_attn"], cfg)
        de_out = pallas_add_layer_norm(sa_out, de_out, lp["ln2_g"], lp["ln2_b"], eps)
        ffn_out = pallas_ffn(de_out, lp["ffn"])
        dec_out = pallas_add_layer_norm(de_out, ffn_out, lp["ln3_g"], lp["ln3_b"], eps)
        dec_self_attn_probs.append(sa_prob)
        dec_enc_attn_probs.append(de_prob)

    return dec_out, enc_self_attn_probs, dec_self_attn_probs, dec_enc_attn_probs


def movie_classification_forward(params, cfg, enc_inputs, dec_inputs):
    dec_out, ep, dsp, dep = transformer_forward(params, cfg, enc_inputs, dec_inputs)
    logits = pallas_maxpool_projection(dec_out, params["proj_w_pad"], cfg["n_output"])
    return logits, ep, dsp, dep


# ----------------------------------------------------------------------------
# Deterministic parameter initialization (synthetic; matches module shapes).
# Matmul weights are stored in bf16; biases / LN params / embeddings stay f32.
# The 1/sqrt(d_head) attention scale is folded into W_Q/b_Q here (exact rewrite).
# ----------------------------------------------------------------------------
def init_params(cfg, key):
    D, H, dh, Dff = cfg["d_hidn"], cfg["n_head"], cfg["d_head"], cfg["d_ff"]
    Dqk = H * dh
    q_scale = 1.0 / math.sqrt(dh)
    keys = iter(jax.random.split(key, 512))

    def nrm(shape, scale=0.02):
        return scale * jax.random.normal(next(keys), shape, jnp.float32)

    def self_attn_params():
        # W_Q | W_K | W_V concatenated column-wise into one fused projection weight
        w = nrm((D, 3 * Dqk))
        b = nrm((1, 3 * Dqk))
        w = w.at[:, :Dqk].multiply(q_scale)      # fold softmax scale into Q projection
        b = b.at[:, :Dqk].multiply(q_scale)
        return dict(w_qkv=w.astype(jnp.bfloat16), b_qkv=b,
                    wo=nrm((Dqk, D)).astype(jnp.bfloat16), bo=nrm((1, D)))

    def cross_attn_params():
        return dict(
            w_q=(nrm((D, Dqk)) * q_scale).astype(jnp.bfloat16),
            b_q=nrm((1, Dqk)) * q_scale,
            w_kv=nrm((D, 2 * Dqk)).astype(jnp.bfloat16),     # fused K|V projection
            b_kv=nrm((1, 2 * Dqk)),
            wo=nrm((Dqk, D)).astype(jnp.bfloat16), bo=nrm((1, D)),
        )

    def ffn_params():
        # conv1: Conv1d(D, Dff, 1) ; conv2: Conv1d(Dff, D, 1) -- stored as (in, out) mats
        return dict(w1=nrm((D, Dff)).astype(jnp.bfloat16), b1=nrm((1, Dff)),
                    w2=nrm((Dff, D)).astype(jnp.bfloat16), b2=nrm((1, D)))

    def ln_pair():
        return jnp.ones((1, D), jnp.float32), jnp.zeros((1, D), jnp.float32)

    enc_layers = []
    for _ in range(cfg["n_layer"]):
        g1, b1 = ln_pair()
        g2, b2 = ln_pair()
        enc_layers.append(dict(self_attn=self_attn_params(), ffn=ffn_params(),
                               ln1_g=g1, ln1_b=b1, ln2_g=g2, ln2_b=b2))

    dec_layers = []
    for _ in range(cfg["n_layer"]):
        g1, b1 = ln_pair()
        g2, b2 = ln_pair()
        g3, b3 = ln_pair()
        dec_layers.append(dict(self_attn=self_attn_params(),
                               dec_enc_attn=cross_attn_params(),
                               ffn=ffn_params(),
                               ln1_g=g1, ln1_b=b1, ln2_g=g2, ln2_b=b2,
                               ln3_g=g3, ln3_b=b3))

    # nn.Linear(d_hidn, n_output, bias=False) -- zero-padded to a 128-lane-dense slab
    n_out = cfg["n_output"]
    n_pad = ((n_out + 127) // 128) * 128
    proj_w = nrm((D, n_out))
    proj_w_pad = jnp.zeros((D, n_pad), jnp.float32).at[:, :n_out].set(proj_w)

    params = dict(
        enc_emb=nrm((cfg["n_enc_vocab"], D), scale=1.0),
        dec_emb=nrm((cfg["n_dec_vocab"], D), scale=1.0),
        enc_pos=get_sinusoid_encoding_table(cfg["n_enc_seq"] + 1, D),
        dec_pos=get_sinusoid_encoding_table(cfg["n_dec_seq"] + 1, D),
        enc_layers=enc_layers,
        dec_layers=dec_layers,
        proj_w_pad=proj_w_pad.astype(jnp.bfloat16),
    )
    return params


# ----------------------------------------------------------------------------
if __name__ == "__main__":
    cfg = dict(
        n_enc_vocab=16, n_dec_vocab=16,
        n_enc_seq=8, n_dec_seq=8,
        n_layer=2, d_hidn=32, i_pad=0,
        d_ff=64, n_head=2, d_head=16,
        dropout=0.0, layer_norm_epsilon=1e-12, n_output=4,
    )
    B = 2

    key = jax.random.PRNGKey(0)
    kp, ke, kd = jax.random.split(key, 3)
    params = init_params(cfg, kp)

    enc_inputs = jax.random.randint(ke, (B, cfg["n_enc_seq"]), 1, cfg["n_enc_vocab"],
                                    dtype=jnp.int32)
    enc_inputs = enc_inputs.at[0, -2:].set(cfg["i_pad"])      # exercise pad masking
    dec_inputs = jax.random.randint(kd, (B, cfg["n_dec_seq"]), 1, cfg["n_dec_vocab"],
                                    dtype=jnp.int32)
    dec_inputs = dec_inputs.at[1, -3:].set(cfg["i_pad"])

    logits, enc_probs, dec_self_probs, dec_enc_probs = movie_classification_forward(
        params, cfg, enc_inputs, dec_inputs)

    jax.block_until_ready(logits)
    for p in enc_probs + dec_self_probs + dec_enc_probs:
        jax.block_until_ready(p)

    assert logits.shape == (B, cfg["n_output"])
    assert logits.dtype == jnp.float32
    assert len(enc_probs) == cfg["n_layer"]
    assert enc_probs[0].shape == (B, cfg["n_head"], cfg["n_enc_seq"], cfg["n_enc_seq"])
    assert dec_self_probs[0].shape == (B, cfg["n_head"], cfg["n_dec_seq"], cfg["n_dec_seq"])
    assert dec_enc_probs[0].shape == (B, cfg["n_head"], cfg["n_dec_seq"], cfg["n_enc_seq"])
    assert bool(jnp.all(jnp.isfinite(logits)))

    print("KERNEL_OK")
</pallas_src>

<mosaic_0001>
module attributes {stable_mosaic.version = 11 : i64} {
  func.func @_matmul_kernel(%arg0: i32, %arg1: i32, %arg2: i32, %arg3: memref<16x32xf32, #tpu.memory_space<vmem>>, %arg4: memref<32x96xbf16, #tpu.memory_space<vmem>>, %arg5: memref<1x96xf32, #tpu.memory_space<vmem>>, %arg6: memref<16x96xbf16, #tpu.memory_space<vmem>>, %arg7: memref<16x96xf32, #tpu.memory_space<vmem>>) attributes {dimension_semantics = [#tpu.dimension_semantics<parallel>, #tpu.dimension_semantics<parallel>, #tpu.dimension_semantics<arbitrary>], iteration_bounds = array<i64: 1, 1, 1>, scalar_prefetch = 0 : i64, scratch_operands = 1 : i64, tpu.core_type = #tpu.core_type<tc>, window_params = [{transform_indices = @transform_0, window_bounds = array<i64: 16, 32>}, {transform_indices = @transform_1, window_bounds = array<i64: 32, 96>}, {transform_indices = @transform_2, window_bounds = array<i64: 1, 96>}, {transform_indices = @transform_3, window_bounds = array<i64: 16, 96>}]} {
    %c0_i32 = arith.constant 0 : i32
    %0 = arith.cmpi eq, %arg2, %c0_i32 : i32
    %1 = arith.extui %0 : i1 to i32
    %c0_i32_0 = arith.constant 0 : i32
    %2 = arith.cmpi ne, %1, %c0_i32_0 : i32
    scf.if %2 {
      %cst_10 = arith.constant 0.000000e+00 : f32
      %13 = vector.broadcast %cst_10 : f32 to vector<16x96xf32>
      %c0_11 = arith.constant 0 : index
      %c0_12 = arith.constant 0 : index
      %14 = vector.load %arg7[%c0_11, %c0_12] : memref<16x96xf32, #tpu.memory_space<vmem>>, vector<16x96xf32>
      tpu.vector_store %arg7[%c0_11, %c0_12], %13 {strides = array<i32>} : memref<16x96xf32, #tpu.memory_space<vmem>>, vector<16x96xf32>,
    } else {
    }
    %c0 = arith.constant 0 : index
    %c0_1 = arith.constant 0 : index
    %3 = vector.load %arg7[%c0, %c0_1] : memref<16x96xf32, #tpu.memory_space<vmem>>, vector<16x96xf32>
    %c0_2 = arith.constant 0 : index
    %c0_3 = arith.constant 0 : index
    %4 = vector.load %arg3[%c0_2, %c0_3] : memref<16x32xf32, #tpu.memory_space<vmem>>, vector<16x32xf32>
    %5 = arith.truncf %4 : vector<16x32xf32> to vector<16x32xbf16>
    %c0_4 = arith.constant 0 : index
    %c0_5 = arith.constant 0 : index
    %6 = vector.load %arg4[%c0_4, %c0_5] : memref<32x96xbf16, #tpu.memory_space<vmem>>, vector<32x96xbf16>
    %cst = arith.constant dense<0.000000e+00> : vector<16x96xf32>
    %7 = tpu.matmul %5, %6, %cst {dimension_numbers = #tpu.dot_dimension_numbers<[1], [0], [0], [1], [0, 0, 1, 1], [], []>} : vector<16x32xbf16>, vector<32x96xbf16>, vector<16x96xf32> -> vector<16x96xf32>
    %8 = arith.addf %3, %7 : vector<16x96xf32>
    %c0_6 = arith.constant 0 : index
    %c0_7 = arith.constant 0 : index
    %9 = vector.load %arg7[%c0_6, %c0_7] : memref<16x96xf32, #tpu.memory_space<vmem>>, vector<16x96xf32>
    tpu.vector_store %arg7[%c0_6, %c0_7], %8 {strides = array<i32>} : memref<16x96xf32, #tpu.memory_space<vmem>>, vector<16x96xf32>,
    %c0_i32_8 = arith.constant 0 : i32
    %10 = arith.cmpi eq, %arg2, %c0_i32_8 : i32
    %11 = arith.extui %10 : i1 to i32
    %c0_i32_9 = arith.constant 0 : i32
    %12 = arith.cmpi ne, %11, %c0_i32_9 : i32
    scf.if %12 {
      %c0_10 = arith.constant 0 : index
      %c0_11 = arith.constant 0 : index
      %13 = vector.load %arg7[%c0_10, %c0_11] : memref<16x96xf32, #tpu.memory_space<vmem>>, vector<16x96xf32>
      %c0_12 = arith.constant 0 : index
      %c0_13 = arith.constant 0 : index
      %14 = vector.load %arg5[%c0_12, %c0_13] : memref<1x96xf32, #tpu.memory_space<vmem>>, vector<1x96xf32>
      %15 = vector.broadcast %14 : vector<1x96xf32> to vector<16x96xf32>
      %16 = arith.addf %13, %15 : vector<16x96xf32>
      %17 = arith.truncf %16 : vector<16x96xf32> to vector<16x96xbf16>
      %c0_14 = arith.constant 0 : index
      %c0_15 = arith.constant 0 : index
      %18 = vector.load %arg6[%c0_14, %c0_15] : memref<16x96xbf16, #tpu.memory_space<vmem>>, vector<16x96xbf16>
      tpu.vector_store %arg6[%c0_14, %c0_15], %17 {strides = array<i32>} : memref<16x96xbf16, #tpu.memory_space<vmem>>, vector<16x96xbf16>,
    } else {
    }
    return
  }
  func.func @transform_0(%arg0: i32, %arg1: i32, %arg2: i32) -> (i32, i32) {
    %c0_i32 = arith.constant 0 : i32
    return %arg0, %arg2 : i32, i32
  }
  func.func @transform_1(%arg0: i32, %arg1: i32, %arg2: i32) -> (i32, i32) {
    %c0_i32 = arith.constant 0 : i32
    return %arg2, %arg1 : i32, i32
  }
  func.func @transform_2(%arg0: i32, %arg1: i32, %arg2: i32) -> (i32, i32) {
    %c0_i32 = arith.constant 0 : i32
    %c0_i32_0 = arith.constant 0 : i32
    return %c0_i32, %arg1 : i32, i32
  }
  func.func @transform_3(%arg0: i32, %arg1: i32, %arg2: i32) -> (i32, i32) {
    %c0_i32 = arith.constant 0 : i32
    return %arg0, %arg1 : i32, i32
  }
}

</mosaic_0001>

<bundles_post_ra>
// kernel: tpu_custom_call.1
= control target key start
LH: loop header
LB: loop body
LE: loop exit
PB: predicated region body
PF: predicated region fallthrough
CT: control target
= control target key end

     0   :  { %8 = vsyncpa [#allocation4], 0  ;;  %s345_s0 = inlined_call_operand.hbm [shape: f32[16,32], index: 0, kind: input, shape index: {}]   ;;  %s346_s1 = inlined_call_operand.hbm [shape: bf16[32,96], index: 1, kind: input, shape index: {}]   ;;  %s347_s2 = inlined_call_operand.vmem [shape: f32[1,96], index: 2, kind: input, shape index: {}]   ;;  %s348_s3 = inlined_call_operand.hbm [shape: bf16[16,96], index: 3, kind: output, shape index: {}]  }
   0x1   :  { %9 = vsyncpa [#allocation7], 0 }
   0x2   :  { %10 = vsyncpa [#allocation5], 0  ;;  %s267_s12 = smov [#allocation3]   ;;  %s195_s16 = scalar_lea.hbm %s345_s0, 256 }
   0x3   :  { %s16_s13 = sshll.u32 %s267_s12, 4  ;;  %p196_p0 = scmp.ne.s32.totalorder %s345_s0, %s195_s16  ;;  %s17_s13 = int_to_ptr.vmem [resolvable:$true] %s16_s13 }
   0x4   :  { %p199_p1 = scmp.lt.u32.totalorder %s195_s16, %s345_s0 }
   0x6   :  { %p201_p2 = pnand %p199_p1, %p196_p0 }
   0x8   :  { %204 = shalt.err (!%p201_p2)
}
   0x9   :  { %s205_s21 = scalar_lea.vmem %s17_s13, 256  ;;  %p210_p4 = scmp.lt.s32.totalorder %s17_s13, %s17_s13 }
   0xa   :  { %p206_p3 = scmp.ne.s32.totalorder %s17_s13, %s205_s21  ;;  %p211_p5 = scmp.lt.s32.totalorder %s205_s21, %s205_s21 }
   0xc   :  { %p212_p6 = por %p211_p5, %p210_p4 }
   0xe   :  { %p213_p7 = pnand %p212_p6, %p206_p3 }
  0x10   :  { %216 = shalt.err (!%p213_p7)
}
  0x11   :  { %s268_s22 = smov 128   ;;  %s269_s23 = smov 8  }
  0x12   :  { %22 = dma.hbm_to_vmem [thread:$0]  %s345_s0, 256, %s17_s13, [#allocation4], %s268_s22, %s268_s22, %s269_s23  }
  0x13   :  { %s270_s26 = smov [#allocation6]   ;;  %s217_s30 = scalar_lea.hbm %s346_s1, 256 }
  0x14   :  { %s28_s27 = sshll.u32 %s270_s26, 4  ;;  %p218_p8 = scmp.ne.s32.totalorder %s346_s1, %s217_s30  ;;  %s29_s27 = int_to_ptr.vmem [resolvable:$true] %s28_s27 }
  0x15   :  { %p221_p9 = scmp.lt.u32.totalorder %s217_s30, %s346_s1 }
  0x17   :  { %p223_p10 = pnand %p221_p9, %p218_p8 }
  0x19   :  { %226 = shalt.err (!%p223_p10)
}
  0x1a   :  { %s227_s8 = scalar_lea.vmem %s29_s27, 256  ;;  %p232_p12 = scmp.lt.s32.totalorder %s29_s27, %s29_s27 }
  0x1b   :  { %p228_p11 = scmp.ne.s32.totalorder %s29_s27, %s227_s8  ;;  %p233_p13 = scmp.lt.s32.totalorder %s227_s8, %s227_s8 }
  0x1d   :  { %p234_p0 = por %p233_p13, %p232_p12 }
  0x1f   :  { %p235_p1 = pnand %p234_p0, %p228_p11 }
  0x21   :  { %238 = shalt.err (!%p235_p1)
}
  0x22   :  { %s271_s0 = smov 64   ;;  %s272_s9 = smov 4  }
  0x23   :  { %34 = dma.hbm_to_vmem [thread:$0]  %s346_s1, 256, %s29_s27, [#allocation7], %s271_s0, %s271_s0, %s272_s9  }
  0x24   :  { %261 = dma.done.wait [#allocation4], 256  }
  0x25   :  { %262 = vsyncadd [#allocation4], 4294967040 }
  0x26   :  { %263 = dma.done.wait [#allocation7], 256  }
  0x27   :  { %264 = vsyncadd [#allocation7], 4294967040  ;;  %vm48_vm0 = vcmask 785408   ;;  %v273_v0 = vmov 0.0   ;;  %vm274_vm1 = vmmov 0   ;;  %v193_v1 = vld [vmem:[#allocation6] sm:$0xff]  }
  0x28   :  { %49 = vst.msk [vmem:[#allocation2] sm:$0xff] %vm48_vm0, %v273_v0  ;;  %50 = vst.msk [vmem:[#allocation2 + $0x8] sm:$0xff] %vm48_vm0, %v273_v0  ;;  %176 = vmatprep.subr.bf16.mxu0 %v273_v0  ;;  %180 = vmatprep.mubr.msk.bf16.mxu0 %vm274_vm1, %v273_v0  ;;  %v194_v2 = vld [vmem:[#allocation6 + $0x8] sm:$0xff]   ;;  %v53_v3 = vld [vmem:[#allocation3] sm:$0xff]  ;;  %vm72_vm2 = vcmask 261120   ;;  %vm144_vm3 = vcmask 781312  }
  0x29   :  { %177 = vmatpush3.bf16.msra.mxu0 %v193_v1  ;;  %v54_v4 = vld [vmem:[#allocation3 + $0x8] sm:$0xff]  ;;  %v168_v14 = vld [vmem:[%s347_s2] ss:$0 sm:$0xff]  ;;  %s275_s13 = smov [#allocation8]  }
  0x2a   :  { %178 = vmatprep.subr.bf16.mxu0 %v273_v0  ;;  %v55_v5 = vpack.c.bf16 %v54_v4, %v53_v3  ;;  %s152_s14 = sshll.u32 %s275_s13, 4  ;;  %s153_s14 = int_to_ptr.vmem [resolvable:$true] %s152_s14 }
  0x2b   :  { %s239_s15 = scalar_lea.vmem %s153_s14, 128  ;;  %p244_p3 = scmp.lt.s32.totalorder %s153_s14, %s153_s14 }
  0x2c   :  { %p240_p2 = scmp.ne.s32.totalorder %s153_s14, %s239_s15  ;;  %p245_p4 = scmp.lt.s32.totalorder %s239_s15, %s239_s15 }
  0x2d   :  { %179 = vmatpush3.bf16.msra.mxu0 %v194_v2 }
  0x2e   :  { %p246_p5 = por %p245_p4, %p244_p3 }
  0x2f   :  { %v51_v6 = vld [vmem:[#allocation2] sm:$0xff]  ;;  %v52_v8 = vld [vmem:[#allocation2 + $0x8] sm:$0xff] }
  0x30   :  { %181 = vmatmul.mubr.msk.bf16.vlgmr.msra.gmra.mrb[0].mxu0 %vm72_vm2, %v55_v5  ;;  %p247_p6 = pnand %p246_p5, %p240_p2 }
 0x103   :  { %v110_v7 = vpop.f32.mrb[0].mxu0 }
 0x104   :  { %v117_v9 = vadd.f32 %v110_v7, %v51_v6  ;;  %v182_v10 = vpop.f32.mrb[1].mxu0 }
 0x105   :  { %v113_v11 = vpop.f32.mrb[2].mxu0 }
 0x106   :  { %120 = vst.msk [vmem:[#allocation2] sm:$0xff] %vm48_vm0, %v117_v9  ;;  %v118_v12 = vadd.f32 %v113_v11, %v52_v8  ;;  %v183_v13 = vpop.f32.mrb[3].mxu0 }
 0x108   :  { %121 = vst.msk [vmem:[#allocation2 + $0x8] sm:$0xff] %vm48_vm0, %v118_v12 }
 0x10d   :  { %v125_v15 = vld [vmem:[#allocation2] sm:$0xff] }
 0x10e   :  { %v134_v16 = vadd.f32 %v168_v14, %v125_v15 }
 0x10f   :  { %v126_v17 = vld [vmem:[#allocation2 + $0x8] sm:$0xff] }
 0x110   :  { %v135_v18 = vadd.f32 %v168_v14, %v126_v17  ;;  %v171_v19 = vpack.c.bf16 %v134_v16, %v134_v16 }
 0x112   :  { %v172_v20 = vpack.c.bf16 %v135_v18, %v135_v18  ;;  %145 = vst.msk [vmem:[#allocation8] sm:$0xf] %vm144_vm3, %v171_v19 }
 0x114   :  { %146 = vst.msk [vmem:[#allocation8 + $0x4] sm:$0xf] %vm144_vm3, %v172_v20 }
 0x115   :  { %250 = shalt.err (!%p247_p6)
}
 0x116   :  { %s251_s17 = scalar_lea.hbm %s348_s3, 128 }
 0x117   :  { %p252_p7 = scmp.ne.s32.totalorder %s348_s3, %s251_s17  ;;  %p255_p8 = scmp.lt.u32.totalorder %s251_s17, %s348_s3 }
 0x119   :  { %p257_p9 = pnand %p255_p8, %p252_p7 }
 0x11b   :  { %260 = shalt.err (!%p257_p9)
}
 0x11c   :  { %158 = dma.vmem_to_hbm [thread:$0]  %s153_s14, 128, %s348_s3, [#allocation5], %s271_s0, %s271_s0, %s272_s9  }
 0x11d   :  { %265 = dma.done.wait [#allocation5], 128  }
 0x11e   :  { %266 = vsyncadd [#allocation5], 4294967168 }
 0x11f   :  { %162 = vsyncpa [#allocation4], 1 }
 0x120   :  { %163 = vsyncpa [#allocation7], 1 }
 0x121   :  { %164 = vsyncpa [#allocation5], 1 }

</bundles_post_ra>
